<compile_context>
chip_gen: v5e
topology: v5e:2x2
jax: 0.10.0
libtpu: 0.0.40
codegen_flags: <defaults>
</compile_context>

<pallas_src>
import jax
import jax.numpy as jnp
from jax.experimental import pallas as pl
from jax.experimental.pallas import tpu as pltpu

LANES = 128
MAX_TILE_ROWS = 2048   # 2048 x 128 f32 = 1 MiB per input tile
NUM_PARTS = 2          # split the reduction across up to 2 TensorCores (v7x)


def _adv_d_loss_real_kernel(x_ref, o_ref):
    """Accumulate sum(softplus(-x)) of each tile into the resident (8, LANES) output block."""
    t = pl.program_id(1)

    @pl.when(t == 0)
    def _():
        o_ref[...] = jnp.zeros_like(o_ref)

    x = x_ref[...]
    # numerically stable softplus(-x) = max(-x, 0) + log1p(exp(-|x|))
    z = -x
    sp = jnp.maximum(z, 0.0) + jnp.log1p(jnp.exp(-jnp.abs(z)))
    # Fold rows into the (8, LANES) accumulator: pure elementwise VPU adds,
    # no cross-lane/sublane XLU work in the steady state.
    o_ref[...] += jnp.sum(sp.reshape(-1, 8, LANES), axis=0)


def adv_d_loss_real(real_pred):
    """JAX/Pallas equivalent of AdvDLoss_real.forward: softplus(-real_pred).mean()."""
    x = real_pred.astype(jnp.float32).reshape(-1)
    n = x.shape[0]                                    # static Python int

    rows = (n + LANES - 1) // LANES
    rows = ((rows + 7) // 8) * 8                      # sublane-align
    tile_rows = min(MAX_TILE_ROWS, rows)
    n_tiles = (rows + tile_rows - 1) // tile_rows
    num_parts = NUM_PARTS if n_tiles >= NUM_PARTS else 1
    n_tiles = ((n_tiles + num_parts - 1) // num_parts) * num_parts
    tiles_per_part = n_tiles // num_parts
    padded_rows = n_tiles * tile_rows
    padded = padded_rows * LANES

    if padded != n:
        # softplus(-inf) == 0 exactly, so +inf padding adds nothing to the sum.
        x = jnp.pad(x, (0, padded - n), constant_values=jnp.inf)
    x2d = x.reshape(padded_rows, LANES)

    partials = pl.pallas_call(
        _adv_d_loss_real_kernel,
        out_shape=jax.ShapeDtypeStruct((num_parts * 8, LANES), jnp.float32),
        grid=(num_parts, tiles_per_part),
        in_specs=[
            pl.BlockSpec((tile_rows, LANES),
                         lambda p, t: (p * tiles_per_part + t, 0)),
        ],
        out_specs=pl.BlockSpec((8, LANES), lambda p, t: (p, 0)),
        compiler_params=pltpu.CompilerParams(
            dimension_semantics=("parallel", "arbitrary"),
        ),
        cost_estimate=pl.CostEstimate(
            flops=6 * n, transcendentals=2 * n, bytes_accessed=4 * n),
    )(x2d)

    # Single tiny cross-lane reduction + mean outside the kernel.
    return jnp.sum(partials) / n


if __name__ == "__main__":
    key = jax.random.PRNGKey(0)

    # Primary small case: typical discriminator logits (B, C, H, W).
    real_pred = jax.random.normal(key, (2, 4, 16, 16), dtype=jnp.float32)
    loss = adv_d_loss_real(real_pred)
    jax.block_until_ready(loss)
    ref = jnp.mean(jnp.logaddexp(0.0, -real_pred))
    assert jnp.allclose(loss, ref, rtol=1e-5, atol=1e-6), (loss, ref)

    # Ragged case (not a multiple of 128): exercises the +inf tail padding.
    k1, k2 = jax.random.split(key)
    ragged = jax.random.normal(k1, (3, 5, 7, 9), dtype=jnp.float32)
    loss_r = adv_d_loss_real(ragged)
    jax.block_until_ready(loss_r)
    ref_r = jnp.mean(jnp.logaddexp(0.0, -ragged))
    assert jnp.allclose(loss_r, ref_r, rtol=1e-5, atol=1e-6), (loss_r, ref_r)

    # Multi-tile case: exercises the 2-part (parallel) axis and t-accumulation.
    big = jax.random.normal(k2, (8, 16, 64, 128), dtype=jnp.float32)
    loss_b = adv_d_loss_real(big)
    jax.block_until_ready(loss_b)
    ref_b = jnp.mean(jnp.logaddexp(0.0, -big))
    assert jnp.allclose(loss_b, ref_b, rtol=1e-4, atol=1e-6), (loss_b, ref_b)

    print("KERNEL_OK")
</pallas_src>

<mosaic_0001>
module attributes {stable_mosaic.version = 11 : i64} {
  func.func @_adv_d_loss_real_kernel(%arg0: i32, %arg1: i32, %arg2: memref<16x128xf32, #tpu.memory_space<vmem>>, %arg3: memref<8x128xf32, #tpu.memory_space<vmem>>) attributes {dimension_semantics = [#tpu.dimension_semantics<parallel>, #tpu.dimension_semantics<arbitrary>], iteration_bounds = array<i64: 1, 1>, scalar_prefetch = 0 : i64, scratch_operands = 0 : i64, tpu.core_type = #tpu.core_type<tc>, window_params = [{transform_indices = @transform_0, window_bounds = array<i64: 16, 128>}, {transform_indices = @transform_1, window_bounds = array<i64: 8, 128>}]} {
    %c0_i32 = arith.constant 0 : i32
    %0 = arith.cmpi eq, %arg1, %c0_i32 : i32
    %1 = arith.extui %0 : i1 to i32
    %c0_i32_0 = arith.constant 0 : i32
    %2 = arith.cmpi ne, %1, %c0_i32_0 : i32
    scf.if %2 {
      %cst_9 = arith.constant 0.000000e+00 : f32
      %19 = vector.broadcast %cst_9 : f32 to vector<8x128xf32>
      %c0_10 = arith.constant 0 : index
      %c0_11 = arith.constant 0 : index
      %20 = vector.load %arg3[%c0_10, %c0_11] : memref<8x128xf32, #tpu.memory_space<vmem>>, vector<8x128xf32>
      tpu.vector_store %arg3[%c0_10, %c0_11], %19 {strides = array<i32>} : memref<8x128xf32, #tpu.memory_space<vmem>>, vector<8x128xf32>,
    } else {
    }
    %c0 = arith.constant 0 : index
    %c0_1 = arith.constant 0 : index
    %3 = vector.load %arg2[%c0, %c0_1] : memref<16x128xf32, #tpu.memory_space<vmem>>, vector<16x128xf32>
    %cst = arith.constant 0.000000e+00 : f32
    %4 = vector.broadcast %cst : f32 to vector<16x128xf32>
    %5 = arith.subf %4, %3 : vector<16x128xf32>
    %cst_2 = arith.constant 0.000000e+00 : f32
    %6 = vector.broadcast %cst_2 : f32 to vector<16x128xf32>
    %7 = arith.maximumf %5, %6 : vector<16x128xf32>
    %8 = math.absf %5 : vector<16x128xf32>
    %cst_3 = arith.constant 0.000000e+00 : f32
    %9 = vector.broadcast %cst_3 : f32 to vector<16x128xf32>
    %10 = arith.subf %9, %8 : vector<16x128xf32>
    %11 = math.exp %10 : vector<16x128xf32>
    %12 = math.log1p %11 : vector<16x128xf32>
    %13 = arith.addf %7, %12 : vector<16x128xf32>
    %c0_4 = arith.constant 0 : index
    %c0_5 = arith.constant 0 : index
    %14 = vector.load %arg3[%c0_4, %c0_5] : memref<8x128xf32, #tpu.memory_space<vmem>>, vector<8x128xf32>
    %15 = vector.shape_cast %13 : vector<16x128xf32> to vector<2x8x128xf32>
    %cst_6 = arith.constant dense<0.000000e+00> : vector<8x128xf32>
    %16 = vector.multi_reduction <add>, %15, %cst_6 [0] : vector<2x8x128xf32> to vector<8x128xf32>
    %17 = arith.addf %14, %16 : vector<8x128xf32>
    %c0_7 = arith.constant 0 : index
    %c0_8 = arith.constant 0 : index
    %18 = vector.load %arg3[%c0_7, %c0_8] : memref<8x128xf32, #tpu.memory_space<vmem>>, vector<8x128xf32>
    tpu.vector_store %arg3[%c0_7, %c0_8], %17 {strides = array<i32>} : memref<8x128xf32, #tpu.memory_space<vmem>>, vector<8x128xf32>,
    return
  }
  func.func @transform_0(%arg0: i32, %arg1: i32) -> (i32, i32) {
    %c1_i32 = arith.constant 1 : i32
    %0 = arith.muli %arg0, %c1_i32 : i32
    %1 = arith.addi %0, %arg1 : i32
    %c0_i32 = arith.constant 0 : i32
    %c0_i32_0 = arith.constant 0 : i32
    return %1, %c0_i32 : i32, i32
  }
  func.func @transform_1(%arg0: i32, %arg1: i32) -> (i32, i32) {
    %c0_i32 = arith.constant 0 : i32
    %c0_i32_0 = arith.constant 0 : i32
    return %arg0, %c0_i32 : i32, i32
  }
}

</mosaic_0001>

<bundles_post_ra>
// kernel: tpu_custom_call.1
= control target key start
LH: loop header
LB: loop body
LE: loop exit
PB: predicated region body
PF: predicated region fallthrough
CT: control target
= control target key end

     0   :  { %6 = vsyncpa [#allocation3], 0  ;;  %s176_s0 = inlined_call_operand.hbm [shape: f32[16,128], index: 0, kind: input, shape index: {}]   ;;  %s177_s1 = inlined_call_operand.hbm [shape: f32[8,128], index: 1, kind: output, shape index: {}]  }
   0x1   :  { %7 = vsyncpa [#allocation4], 0  ;;  %s16_s8 = sshll.u32 %s176_s0, 4  ;;  %s156_s9 = smov [#allocation2]   ;;  %s17_s8 = int_to_ptr.hbm [resolvable:$true] %s16_s8 }
   0x2   :  { %s18_s10 = sshll.u32 %s156_s9, 4  ;;  %s157_s11 = smov 128   ;;  %s19_s10 = int_to_ptr.vmem [resolvable:$true] %s18_s10 }
   0x3   :  { %s158_s12 = smov 8  }
   0x4   :  { %24 = dma.hbm_to_vmem [thread:$0]  %s17_s8, 256, %s19_s10, [#allocation3], %s157_s11, %s157_s11, %s158_s12  }
   0x5   :  { %152 = dma.done.wait [#allocation3], 256  }
   0x6   :  { %153 = vsyncadd [#allocation3], 4294967040  ;;  %v36_v0 = vld [vmem:[#allocation2] sm:$0xff]  ;;  %v37_v1 = vld [vmem:[#allocation2 + $0x8] sm:$0xff]  ;;  %s159_s0 = smov [#allocation5]   ;;  %s81_s16 = sshll.u32 %s177_s1, 4  ;;  %s82_s16 = int_to_ptr.hbm [resolvable:$true] %s81_s16 }
   0x7   :  { %v38_v2 = vsub.f32 0.0, %v36_v0  ;;  %v39_v3 = vsub.f32 0.0, %v37_v1  ;;  %s79_s13 = sshll.u32 %s159_s0, 4  ;;  %s80_s13 = int_to_ptr.vmem [resolvable:$true] %s79_s13 }
   0x9   :  { %v42_v4 = vand.u32 2147483647, %v38_v2  ;;  %v43_v5 = vand.u32 2147483647, %v39_v3  ;;  %v40_v22 = vmax.f32 %v38_v2, 0.0  ;;  %v41_v25 = vmax.f32 %v39_v3, 0.0 }
   0xb   :  { %v44_v6 = vsub.f32 0.0, %v42_v4  ;;  %v45_v7 = vsub.f32 0.0, %v43_v5 }
   0xd   :  { %v46_v8 = vmul.f32 1.442695, %v44_v6  ;;  %v48_v9 = vmul.f32 1.442695, %v45_v7 }
   0xf   :  { %96 = vpow2.f32 %v46_v8 }
  0x10   :  { %98 = vpow2.f32 %v48_v9 }
  0x15   :  { %v97_v10 = vpop.eup %96 }
  0x16   :  { %v99_v11 = vpop.eup %98  ;;  %v50_v12 = vadd.f32 1.0, %v97_v10  ;;  %v53_v13 = vmul.f32 -0.5, %v97_v10  ;;  %v56_v17 = vand.u32 2147483647, %v97_v10 }
  0x17   :  { %v59_v14 = vadd.f32 1.0, %v99_v11  ;;  %v62_v15 = vmul.f32 -0.5, %v99_v11  ;;  %v65_v19 = vand.u32 2147483647, %v99_v11 }
  0x18   :  { %100 = vlog2.f32 %v50_v12  ;;  %v54_v16 = vadd.f32 1.0, %v53_v13  ;;  %vm57_vm0 = vcmp.lt.f32.partialorder %v56_v17, 0.0004427343 }
  0x19   :  { %102 = vlog2.f32 %v59_v14  ;;  %v63_v18 = vadd.f32 1.0, %v62_v15  ;;  %vm66_vm1 = vcmp.lt.f32.partialorder %v65_v19, 0.0004427343 }
  0x1a   :  { %v55_v20 = vmul.f32 %v97_v10, %v54_v16 }
  0x1b   :  { %v64_v23 = vmul.f32 %v99_v11, %v63_v18 }
  0x1e   :  { %v101_v21 = vpop.eup %100 }
  0x1f   :  { %v103_v24 = vpop.eup %102  ;;  %v52_v26 = vmul.f32 0.6931472, %v101_v21 }
  0x20   :  { %v61_v27 = vmul.f32 0.6931472, %v103_v24 }
  0x21   :  { %v58_v28 = vsel %vm57_vm0, %v55_v20, %v52_v26 }
  0x22   :  { %v67_v29 = vsel %vm66_vm1, %v64_v23, %v61_v27  ;;  %v68_v30 = vadd.f32 %v58_v28, %v40_v22 }
  0x23   :  { %v69_v31 = vadd.f32 %v67_v29, %v41_v25 }
  0x25   :  { %v71_v32 = vadd.f32 %v69_v31, %v68_v30 }
  0x27   :  { %73 = vst [vmem:[#allocation5] sm:$0xff] %v71_v32 }
  0x28   :  { %84 = dma.vmem_to_hbm [thread:$0]  %s80_s13, 128, %s82_s16, [#allocation4]  }
  0x29   :  { %154 = dma.done.wait [#allocation4], 128  }
  0x2a   :  { %155 = vsyncadd [#allocation4], 4294967168 }
  0x2b   :  { %89 = vsyncpa [#allocation3], 1 }
  0x2c   :  { %90 = vsyncpa [#allocation4], 1 }

</bundles_post_ra>
